<compile_context>
chip_gen: v7x
topology: tpu7x:2x2x1
jax: 0.10.0
libtpu: 0.0.40
codegen_flags: <defaults>
</compile_context>

<pallas_src>
import jax
import jax.numpy as jnp
from jax.experimental import pallas as pl
from jax.experimental.pallas import tpu as pltpu


# ---------------------------------------------------------------------------
# Pallas kernels
# ---------------------------------------------------------------------------
def _add_kernel(fx_ref, x_ref, o_ref):
    """Tiled residual add: o = fx + x  (one (TILE, LANE) block per grid step)."""
    o_ref[...] = fx_ref[...] + x_ref[...]


def _make_fused_kernel(fn, kwargs):
    """Kernel that applies an *elementwise* fn in-tile and adds the residual."""
    def kernel(x_ref, o_ref):
        x = x_ref[...]
        o_ref[...] = (fn(x, **kwargs) + x).astype(o_ref.dtype)
    return kernel


# ---------------------------------------------------------------------------
# Lane-dense 2-D layout + tiling helpers
# ---------------------------------------------------------------------------
_LANE_CANDIDATES = (2048, 1024, 512, 256, 128)


def _choose_2d(total):
    """Pick (rows, lane, pad) so the flattened tensor becomes (rows, lane),
    lane a multiple of 128 (lane-dense), padding with `pad` trailing elems."""
    for lane in _LANE_CANDIDATES:
        if total % lane == 0:
            return total // lane, lane, 0
    lane = 128
    pad = (-total) % lane
    return (total + pad) // lane, lane, pad


def _tile_rows(rows, lane, itemsize):
    """~2 MiB per operand tile: with double-buffering and <=3 operands this is
    <=12 MiB of VMEM — safe on v5e's 16 MiB default and v7x's 32 MiB scoped."""
    target_bytes = 2 * 1024 * 1024
    t = max(8, target_bytes // (lane * itemsize))
    t = min(t, rows)
    if t < rows:
        t = max(8, (t // 8) * 8)  # keep sublane-aligned blocks
    return t


def _to_slab(arr, rows, lane, pad):
    flat = arr.reshape(-1)
    if pad:
        flat = jnp.pad(flat, (0, pad))
    return flat.reshape(rows, lane)


def _from_slab(slab, total, pad, shape):
    flat = slab.reshape(-1)
    if pad:
        flat = flat[:total]
    return flat.reshape(shape)


# ---------------------------------------------------------------------------
# Residual module
# ---------------------------------------------------------------------------
class Residual:
    """Pallas-backed Residual: __call__(x, **kw) = fn(x, **kw) + x.

    elementwise=True  -> fn is applied *inside* the kernel tile-by-tile
                         (valid only for shape-preserving elementwise fns);
                         fn(x) never touches HBM.
    elementwise=False -> fn runs as plain JAX; the kernel does the tiled add.
    """

    def __init__(self, fn, elementwise=False):
        self.fn = fn
        self.elementwise = elementwise

    def __call__(self, x, **kwargs):
        if self.elementwise:
            return self._fused(x, kwargs)
        fx = self.fn(x, **kwargs)
        return self._add(fx, x)

    # -- fused path: fn applied in-kernel -----------------------------------
    def _fused(self, x, kwargs):
        total = x.size
        rows, lane, pad = _choose_2d(total)
        xs = _to_slab(x, rows, lane, pad)
        tile = _tile_rows(rows, lane, jnp.dtype(x.dtype).itemsize)
        out = pl.pallas_call(
            _make_fused_kernel(self.fn, kwargs),
            out_shape=jax.ShapeDtypeStruct((rows, lane), x.dtype),
            grid=(pl.cdiv(rows, tile),),
            in_specs=[pl.BlockSpec((tile, lane), lambda i: (i, 0))],
            out_specs=pl.BlockSpec((tile, lane), lambda i: (i, 0)),
            compiler_params=pltpu.CompilerParams(
                dimension_semantics=("parallel",)),
        )(xs)
        return _from_slab(out, total, pad, x.shape)

    # -- generic path: tiled residual add ------------------------------------
    def _add(self, fx, x):
        assert fx.shape == x.shape, (fx.shape, x.shape)
        fx = fx.astype(x.dtype)
        total = x.size
        rows, lane, pad = _choose_2d(total)
        a = _to_slab(fx, rows, lane, pad)
        b = _to_slab(x, rows, lane, pad)
        tile = _tile_rows(rows, lane, jnp.dtype(x.dtype).itemsize)
        out = pl.pallas_call(
            _add_kernel,
            out_shape=jax.ShapeDtypeStruct((rows, lane), x.dtype),
            grid=(pl.cdiv(rows, tile),),
            in_specs=[pl.BlockSpec((tile, lane), lambda i: (i, 0)),
                      pl.BlockSpec((tile, lane), lambda i: (i, 0))],
            out_specs=pl.BlockSpec((tile, lane), lambda i: (i, 0)),
            compiler_params=pltpu.CompilerParams(
                dimension_semantics=("parallel",)),
        )(a, b)
        return _from_slab(out, total, pad, x.shape)


# ---------------------------------------------------------------------------
# Demo / correctness check
# ---------------------------------------------------------------------------
if __name__ == "__main__":
    key = jax.random.PRNGKey(0)
    kx, kw, k3 = jax.random.split(key, 3)
    x = jax.random.normal(kx, (2, 4, 16, 16), jnp.float32)

    # 1) Elementwise fn, fused into the kernel (fn(x) never hits HBM).
    res_gelu = Residual(jax.nn.gelu, elementwise=True)
    y1 = jax.block_until_ready(res_gelu(x))
    ref1 = jax.nn.gelu(x) + x
    assert y1.shape == x.shape, y1.shape
    assert jnp.allclose(y1, ref1, atol=1e-5, rtol=1e-5)

    # 2) Arbitrary (non-elementwise) fn: 1x1 channel mix in plain JAX, then
    #    the Pallas kernel performs the tiled residual add.
    # TODO(synk): arbitrary sub-modules (fn) cannot be fused into the kernel;
    # they run as regular JAX and only the residual add is Pallas.
    w = jax.random.normal(kw, (4, 4), jnp.float32) * 0.1

    def channel_mix(z):
        return jnp.einsum("nchw,cd->ndhw", z, w)

    res_mix = Residual(channel_mix)
    y2 = jax.block_until_ready(res_mix(x))
    ref2 = channel_mix(x) + x
    assert y2.shape == x.shape, y2.shape
    assert jnp.allclose(y2, ref2, atol=1e-5, rtol=1e-5)

    # 3) Odd total size exercises the pad-to-lane path.
    x3 = jax.random.normal(k3, (3, 5, 7), jnp.float32)
    res_tanh = Residual(jnp.tanh, elementwise=True)
    y3 = jax.block_until_ready(res_tanh(x3))
    assert y3.shape == x3.shape, y3.shape
    assert jnp.allclose(y3, jnp.tanh(x3) + x3, atol=1e-5, rtol=1e-5)

    print("KERNEL_OK")
</pallas_src>

<mosaic_0001>
module attributes {stable_mosaic.version = 11 : i64} {
  func.func @kernel(%arg0: i32, %arg1: memref<1x2048xf32, #tpu.memory_space<vmem>>, %arg2: memref<1x2048xf32, #tpu.memory_space<vmem>>) attributes {dimension_semantics = [#tpu.dimension_semantics<parallel>], iteration_bounds = array<i64: 1>, scalar_prefetch = 0 : i64, scratch_operands = 0 : i64, tpu.core_type = #tpu.core_type<tc>, window_params = [{transform_indices = @transform_0, window_bounds = array<i64: 1, 2048>}, {transform_indices = @transform_1, window_bounds = array<i64: 1, 2048>}]} {
    %c0 = arith.constant 0 : index
    %c0_0 = arith.constant 0 : index
    %0 = vector.load %arg1[%c0, %c0_0] : memref<1x2048xf32, #tpu.memory_space<vmem>>, vector<1x2048xf32>
    %1 = arith.mulf %0, %0 : vector<1x2048xf32>
    %2 = arith.mulf %0, %1 : vector<1x2048xf32>
    %cst = arith.constant 4.471500e-02 : f32
    %3 = vector.broadcast %cst : f32 to vector<1x2048xf32>
    %4 = arith.mulf %3, %2 : vector<1x2048xf32>
    %5 = arith.addf %0, %4 : vector<1x2048xf32>
    %cst_1 = arith.constant 0.797884583 : f32
    %6 = vector.broadcast %cst_1 : f32 to vector<1x2048xf32>
    %7 = arith.mulf %6, %5 : vector<1x2048xf32>
    %8 = math.tanh %7 : vector<1x2048xf32>
    %cst_2 = arith.constant 1.000000e+00 : f32
    %9 = vector.broadcast %cst_2 : f32 to vector<1x2048xf32>
    %10 = arith.addf %9, %8 : vector<1x2048xf32>
    %cst_3 = arith.constant 5.000000e-01 : f32
    %11 = vector.broadcast %cst_3 : f32 to vector<1x2048xf32>
    %12 = arith.mulf %11, %10 : vector<1x2048xf32>
    %13 = arith.mulf %0, %12 : vector<1x2048xf32>
    %14 = arith.addf %13, %0 : vector<1x2048xf32>
    %c0_4 = arith.constant 0 : index
    %c0_5 = arith.constant 0 : index
    %15 = vector.load %arg2[%c0_4, %c0_5] : memref<1x2048xf32, #tpu.memory_space<vmem>>, vector<1x2048xf32>
    tpu.vector_store %arg2[%c0_4, %c0_5], %14 {strides = array<i32>} : memref<1x2048xf32, #tpu.memory_space<vmem>>, vector<1x2048xf32>,
    return
  }
  func.func @transform_0(%arg0: i32) -> (i32, i32) {
    %c0_i32 = arith.constant 0 : i32
    %c0_i32_0 = arith.constant 0 : i32
    return %arg0, %c0_i32 : i32, i32
  }
  func.func @transform_1(%arg0: i32) -> (i32, i32) {
    %c0_i32 = arith.constant 0 : i32
    %c0_i32_0 = arith.constant 0 : i32
    return %arg0, %c0_i32 : i32, i32
  }
}

</mosaic_0001>

<bundles_post_ra>
// kernel: tpu_custom_call.1
= control target key start
LH: loop header
LB: loop body
LE: loop exit
PB: predicated region body
PF: predicated region fallthrough
CT: control target
= control target key end

     0   :  { %6 = vsyncpa [#allocation3], 0  ;;  %s150_s0 = inlined_call_operand.hbm [shape: f32[1,2048], index: 0, kind: input, shape index: {}]   ;;  %s151_s1 = inlined_call_operand.hbm [shape: f32[1,2048], index: 1, kind: output, shape index: {}]  }
   0x1   :  { %7 = vsyncpa [#allocation4], 0  ;;  %s114_s6 = smov [#allocation2]   ;;  %s66_s10 = scalar_lea.hbm %s150_s0, 256 }
   0x2   :  { %s14_s7 = sshll.u32 %s114_s6, 4  ;;  %p67_p0 = scmp.ne.s32.totalorder %s150_s0, %s66_s10  ;;  %s15_s7 = int_to_ptr.vmem [resolvable:$true] %s14_s7 }
   0x3   :  { %p70_p1 = scmp.lt.u32.totalorder %s66_s10, %s150_s0 }
   0x5   :  { %p72_p2 = pnand %p70_p1, %p67_p0 }
   0x7   :  { %75 = shalt.err (!%p72_p2)
}
   0x8   :  { %s76_s15 = scalar_lea.vmem %s15_s7, 256  ;;  %p81_p4 = scmp.lt.s32.totalorder %s15_s7, %s15_s7 }
   0x9   :  { %p77_p3 = scmp.ne.s32.totalorder %s15_s7, %s76_s15  ;;  %p82_p5 = scmp.lt.s32.totalorder %s76_s15, %s76_s15 }
   0xb   :  { %p83_p6 = por %p82_p5, %p81_p4 }
   0xd   :  { %p84_p7 = pnand %p83_p6, %p77_p3 }
   0xf   :  { %87 = shalt.err (!%p84_p7)
}
  0x10   :  { %17 = dma.hbm_to_vmem [thread:$0]  %s150_s0, 256, %s15_s7, [#allocation3]  }
  0x11   :  { %110 = dma.done.wait [#allocation3], 256  }
  0x12   :  { %111 = vsyncadd [#allocation3], 4294967040  ;;  %v21_v0 = vld [vmem:[#allocation2] sm:$0xff]  ;;  %v22_v1 = vld [vmem:[#allocation2 + $0x8] sm:$0xff]  ;;  %s115_s0 = smov [#allocation5]  }
  0x13   :  { %v23_v2 = vmul.f32 %v21_v0, %v21_v0  ;;  %v24_v3 = vmul.f32 %v22_v1, %v22_v1  ;;  %s51_s18 = sshll.u32 %s115_s0, 4  ;;  %s52_s18 = int_to_ptr.vmem [resolvable:$true] %s51_s18 }
  0x14   :  { %s88_s19 = scalar_lea.vmem %s52_s18, 256  ;;  %p93_p9 = scmp.lt.s32.totalorder %s52_s18, %s52_s18 }
  0x15   :  { %v25_v4 = vmul.f32 %v23_v2, %v21_v0  ;;  %v26_v5 = vmul.f32 %v24_v3, %v22_v1  ;;  %p89_p8 = scmp.ne.s32.totalorder %s52_s18, %s88_s19  ;;  %p94_p10 = scmp.lt.s32.totalorder %s88_s19, %s88_s19 }
  0x17   :  { %v27_v6 = vmul.f32 0.044715, %v25_v4  ;;  %v28_v7 = vmul.f32 0.044715, %v26_v5  ;;  %p95_p11 = por %p94_p10, %p93_p9 }
  0x19   :  { %v29_v8 = vadd.f32 %v27_v6, %v21_v0  ;;  %v30_v9 = vadd.f32 %v28_v7, %v22_v1  ;;  %p96_p12 = pnand %p95_p11, %p89_p8 }
  0x1b   :  { %v31_v10 = vmul.f32 0.7978846, %v29_v8  ;;  %v32_v11 = vmul.f32 0.7978846, %v30_v9 }
  0x1d   :  { %62 = vtanh.f32 %v31_v10 }
  0x1e   :  { %64 = vtanh.f32 %v32_v11 }
  0x27   :  { %v63_v12 = vpop.eup %62 }
  0x28   :  { %v65_v13 = vpop.eup %64  ;;  %v35_v14 = vadd.f32 1.0, %v63_v12 }
  0x29   :  { %v36_v15 = vadd.f32 1.0, %v65_v13 }
  0x2a   :  { %v37_v16 = vmul.f32 0.5, %v35_v14 }
  0x2b   :  { %v38_v17 = vmul.f32 0.5, %v36_v15 }
  0x2c   :  { %v39_v18 = vmul.f32 %v37_v16, %v21_v0 }
  0x2d   :  { %v40_v19 = vmul.f32 %v38_v17, %v22_v1 }
  0x2e   :  { %v41_v20 = vadd.f32 %v39_v18, %v21_v0 }
  0x2f   :  { %v42_v21 = vadd.f32 %v40_v19, %v22_v1 }
  0x30   :  { %43 = vst [vmem:[#allocation5] sm:$0xff] %v41_v20 }
  0x31   :  { %44 = vst [vmem:[#allocation5 + $0x8] sm:$0xff] %v42_v21 }
  0x32   :  { %99 = shalt.err (!%p96_p12)
}
  0x33   :  { %s100_s22 = scalar_lea.hbm %s151_s1, 256 }
  0x34   :  { %p101_p13 = scmp.ne.s32.totalorder %s151_s1, %s100_s22  ;;  %p104_p0 = scmp.lt.u32.totalorder %s100_s22, %s151_s1 }
  0x36   :  { %p106_p1 = pnand %p104_p0, %p101_p13 }
  0x38   :  { %109 = shalt.err (!%p106_p1)
}
  0x39   :  { %54 = dma.vmem_to_hbm [thread:$0]  %s52_s18, 256, %s151_s1, [#allocation4]  }
  0x3a   :  { %112 = dma.done.wait [#allocation4], 256  }
  0x3b   :  { %113 = vsyncadd [#allocation4], 4294967040 }
  0x3c   :  { %58 = vsyncpa [#allocation3], 1 }
  0x3d   :  { %59 = vsyncpa [#allocation4], 1 }

</bundles_post_ra>
